<compile_context>
chip_gen: v7x
topology: tpu7x:2x2x1
jax: 0.10.0
libtpu: 0.0.40
codegen_flags: <defaults>
</compile_context>

<pallas_src>
import math

import numpy as np
import jax
import jax.numpy as jnp
from jax.experimental import pallas as pl
from jax.experimental.pallas import tpu as pltpu


def _cdiv(a, b):
    return -(-a // b)


def _round_up(a, m):
    return _cdiv(a, m) * m


def _level_params(H, W, n):
    """Window / padding for one SPP level (PyTorch formula; int-floored pad,
    which is the standard WSDAN fix for the float padding in the reference)."""
    kh = int(math.ceil(H / n))
    kw = int(math.ceil(W / n))
    ph = int((kh * n - H + 1) / 2)
    pw = int((kw * n - W + 1) / 2)
    if 2 * ph > kh or 2 * pw > kw:
        raise ValueError(
            f"SPP level n={n}: padding ({ph},{pw}) exceeds half the window "
            f"({kh},{kw}); PyTorch MaxPool2d would reject this configuration.")
    exact = (kh * n == H) and (kw * n == W)   # => ph == pw == 0
    return kh, kw, ph, pw, exact


def _pool_windows(src, axis, n, k, pad):
    """Max over n windows of size k (stride k) along `axis` with `pad` logical
    padding before the axis.  Implemented by clamping each window's slice to
    the valid range (padding can never win a max), so no padded copy is built.
    `src` may be a VMEM Ref (windows are loaded straight from the tile) or an
    in-register array (used for the cascaded coarse levels)."""
    size = src.shape[axis]
    ndim = len(src.shape)
    pieces = []
    for i in range(n):
        lo = max(0, i * k - pad)
        hi = min(size, (i + 1) * k - pad)
        idx = tuple(slice(lo, hi) if d == axis else slice(None)
                    for d in range(ndim))
        pieces.append(jnp.max(src[idx], axis=axis, keepdims=True))
    return pieces[0] if len(pieces) == 1 else jnp.concatenate(pieces, axis=axis)


def _make_spp_kernel(ns_sorted, params, out_ns):
    """ns_sorted: distinct pyramid sizes, descending.  params: n -> (kh, kw,
    ph, pw, exact).  out_ns: the n for each output ref (pool_size order)."""

    def kernel(x_ref, *out_refs):                    # x_ref: (bt, ct, H, W)
        computed = {}                                # n -> (pooled (bt,ct,n,n), exact)
        for n in ns_sorted:
            kh, kw, ph, pw, exact = params[n]
            # Cascade: pool the smallest already-computed exact finer grid
            # whose windows tile this level's windows, instead of re-scanning
            # the whole input tile.
            src = None
            for nf in sorted(computed):
                if computed[nf][1] and nf != n and nf % n == 0:
                    src = nf
                    break
            if src is not None:
                pf, _ = computed[src]
                r = src // n
                g = _pool_windows(pf, axis=2, n=n, k=r, pad=0)
                p = _pool_windows(g, axis=3, n=n, k=r, pad=0)
                computed[n] = (p, True)
            else:
                # Row reduction (windows along H) directly from the VMEM tile,
                # then column reduction (windows along W) on the small result.
                g = _pool_windows(x_ref, axis=2, n=n, k=kh, pad=ph)
                p = _pool_windows(g, axis=3, n=n, k=kw, pad=pw)
                computed[n] = (p, exact)
        # One store per level.
        for o_ref, n in zip(out_refs, out_ns):
            o_ref[...] = computed[n][0].astype(o_ref.dtype)

    return kernel


def _pick_blocks(B, C, slice_bytes, target_bytes=8 << 20):
    """Batch/channel block sizes targeting ~target_bytes of VMEM per input
    block while keeping >= 2 (preferably an even number of) grid steps whenever
    B >= 2, so both v7x TensorCores get balanced work."""
    if C * slice_bytes > target_bytes:
        ct = max(1, target_bytes // slice_bytes)
        bt = 1
    else:
        ct = C
        bt = max(1, min(B, target_bytes // (C * slice_bytes)))
        if B >= 2:
            bt = min(bt, _cdiv(B, 2))          # at least 2 batch steps
            nb = _cdiv(B, bt)
            if nb % 2 and nb + 1 <= B:         # odd step count -> bump to even
                bt = _cdiv(B, nb + 1)
    return int(bt), int(ct)


def spp_layer(x, pool_size=(1, 2, 4)):
    """Equivalent of SPPLayer(pool_size).forward(x); x is NCHW."""
    B, C, H, W = x.shape
    pool_size = tuple(int(n) for n in pool_size)
    params = {n: _level_params(H, W, n) for n in set(pool_size)}
    ns_sorted = tuple(sorted(params, reverse=True))

    itemsize = jnp.dtype(x.dtype).itemsize
    # VMEM footprint of one (H, W) slice, accounting for (8, 128) tile padding.
    slice_bytes = _round_up(H, 8) * _round_up(max(W, 1), 128) * itemsize
    bt, ct = _pick_blocks(B, C, slice_bytes)
    grid = (_cdiv(B, bt), _cdiv(C, ct))
    block_bytes = bt * ct * slice_bytes
    # Double-buffered input + temporaries; stays under v7x's 64 MiB/TC VMEM.
    vmem_limit = int(min(48 << 20, max(32 << 20, 3 * block_bytes)))

    kern = _make_spp_kernel(ns_sorted, params, pool_size)
    out_shape = tuple(jax.ShapeDtypeStruct((B, C, n, n), x.dtype)
                      for n in pool_size)
    in_specs = [pl.BlockSpec((bt, ct, H, W), lambda b, c: (b, c, 0, 0))]
    out_specs = tuple(pl.BlockSpec((bt, ct, n, n), lambda b, c: (b, c, 0, 0))
                      for n in pool_size)

    pooled = pl.pallas_call(
        kern,
        out_shape=out_shape,
        grid=grid,
        in_specs=in_specs,
        out_specs=out_specs,
        compiler_params=pltpu.CompilerParams(
            dimension_semantics=("parallel", "parallel"),
            vmem_limit_bytes=vmem_limit),
    )(x)

    # torch: per level out.view(B, -1) (C-major flatten of (B, C, n, n), which
    # is a free row-major reshape here), then concat over levels.
    return jnp.concatenate([p.reshape(B, -1) for p in pooled], axis=1)


def _reference(x, pool_size=(1, 2, 4)):
    """Pure-JAX reference (reduce_window) for correctness checking."""
    B, C, H, W = x.shape
    parts = []
    for n in pool_size:
        kh, kw, ph, pw, _ = _level_params(H, W, int(n))
        xp = jnp.pad(x, ((0, 0), (0, 0), (ph, ph), (pw, pw)),
                     constant_values=-jnp.inf)
        out = jax.lax.reduce_window(xp, -jnp.inf, jax.lax.max,
                                    (1, 1, kh, kw), (1, 1, kh, kw), "VALID")
        # Sanity: symmetric padding + VALID must emit exactly n windows/axis.
        assert out.shape[2] == n and out.shape[3] == n, out.shape
        parts.append(out.reshape(B, -1))
    return jnp.concatenate(parts, axis=1)


if __name__ == "__main__":
    key0, key1 = jax.random.split(jax.random.PRNGKey(0))

    # Main config: divisible H/W, default pyramid (out_length = 1 + 4 + 16).
    pool_size = (1, 2, 4)
    B, C, H, W = 2, 4, 16, 16
    x = jax.random.normal(key0, (B, C, H, W), dtype=jnp.float32)

    out = jax.block_until_ready(spp_layer(x, pool_size))
    assert out.shape == (B, C * sum(n * n for n in pool_size)), out.shape
    ref = jax.block_until_ready(_reference(x, pool_size))
    np.testing.assert_allclose(np.asarray(out), np.asarray(ref),
                               rtol=1e-6, atol=1e-6)

    # Non-divisible regression (padded, clamped-window path): 10x10, n=3.
    x2 = jax.random.normal(key1, (2, 4, 10, 10), dtype=jnp.float32)
    out2 = jax.block_until_ready(spp_layer(x2, (3,)))
    ref2 = jax.block_until_ready(_reference(x2, (3,)))
    np.testing.assert_allclose(np.asarray(out2), np.asarray(ref2),
                               rtol=1e-6, atol=1e-6)

    print("KERNEL_OK")
</pallas_src>

<mosaic_0001>
module attributes {stable_mosaic.version = 11 : i64} {
  func.func @kernel(%arg0: i32, %arg1: i32, %arg2: memref<1x4x16x16xf32, #tpu.memory_space<vmem>>, %arg3: memref<1x4x1x1xf32, #tpu.memory_space<vmem>>, %arg4: memref<1x4x2x2xf32, #tpu.memory_space<vmem>>, %arg5: memref<1x4x4x4xf32, #tpu.memory_space<vmem>>) attributes {dimension_semantics = [#tpu.dimension_semantics<parallel>, #tpu.dimension_semantics<parallel>], iteration_bounds = array<i64: 2, 1>, scalar_prefetch = 0 : i64, scratch_operands = 0 : i64, tpu.core_type = #tpu.core_type<tc>, window_params = [{transform_indices = @transform_0, window_bounds = array<i64: 1, 4, 16, 16>}, {transform_indices = @transform_1, window_bounds = array<i64: 1, 4, 1, 1>}, {transform_indices = @transform_2, window_bounds = array<i64: 1, 4, 2, 2>}, {transform_indices = @transform_3, window_bounds = array<i64: 1, 4, 4, 4>}]} {
    %c0 = arith.constant 0 : index
    %c0_0 = arith.constant 0 : index
    %c0_1 = arith.constant 0 : index
    %c0_2 = arith.constant 0 : index
    %0 = vector.load %arg2[%c0, %c0_0, %c0_1, %c0_2] : memref<1x4x16x16xf32, #tpu.memory_space<vmem>>, vector<1x4x4x16xf32>
    %cst = arith.constant dense<0xFF800000> : vector<1x4x16xf32>
    %1 = vector.multi_reduction <maximumf>, %0, %cst [2] : vector<1x4x4x16xf32> to vector<1x4x16xf32>
    %2 = vector.shape_cast %1 : vector<1x4x16xf32> to vector<1x4x1x16xf32>
    %c0_3 = arith.constant 0 : index
    %c0_4 = arith.constant 0 : index
    %c4 = arith.constant 4 : index
    %c0_5 = arith.constant 0 : index
    %3 = vector.load %arg2[%c0_3, %c0_4, %c4, %c0_5] : memref<1x4x16x16xf32, #tpu.memory_space<vmem>>, vector<1x4x4x16xf32>
    %cst_6 = arith.constant dense<0xFF800000> : vector<1x4x16xf32>
    %4 = vector.multi_reduction <maximumf>, %3, %cst_6 [2] : vector<1x4x4x16xf32> to vector<1x4x16xf32>
    %5 = vector.shape_cast %4 : vector<1x4x16xf32> to vector<1x4x1x16xf32>
    %c0_7 = arith.constant 0 : index
    %c0_8 = arith.constant 0 : index
    %c8 = arith.constant 8 : index
    %c0_9 = arith.constant 0 : index
    %6 = vector.load %arg2[%c0_7, %c0_8, %c8, %c0_9] : memref<1x4x16x16xf32, #tpu.memory_space<vmem>>, vector<1x4x4x16xf32>
    %cst_10 = arith.constant dense<0xFF800000> : vector<1x4x16xf32>
    %7 = vector.multi_reduction <maximumf>, %6, %cst_10 [2] : vector<1x4x4x16xf32> to vector<1x4x16xf32>
    %8 = vector.shape_cast %7 : vector<1x4x16xf32> to vector<1x4x1x16xf32>
    %c0_11 = arith.constant 0 : index
    %c0_12 = arith.constant 0 : index
    %c12 = arith.constant 12 : index
    %c0_13 = arith.constant 0 : index
    %9 = vector.load %arg2[%c0_11, %c0_12, %c12, %c0_13] : memref<1x4x16x16xf32, #tpu.memory_space<vmem>>, vector<1x4x4x16xf32>
    %cst_14 = arith.constant dense<0xFF800000> : vector<1x4x16xf32>
    %10 = vector.multi_reduction <maximumf>, %9, %cst_14 [2] : vector<1x4x4x16xf32> to vector<1x4x16xf32>
    %11 = vector.shape_cast %10 : vector<1x4x16xf32> to vector<1x4x1x16xf32>
    %12 = tpu.concatenate %2, %5, %8, %11 in 2 : vector<1x4x1x16xf32>, vector<1x4x1x16xf32>, vector<1x4x1x16xf32>, vector<1x4x1x16xf32> -> vector<1x4x4x16xf32>
    %13 = vector.extract_strided_slice %12 {offsets = [0, 0, 0, 0], sizes = [1, 4, 4, 4], strides = [1, 1, 1, 1]} : vector<1x4x4x16xf32> to vector<1x4x4x4xf32>
    %cst_15 = arith.constant dense<0xFF800000> : vector<1x4x4xf32>
    %14 = vector.multi_reduction <maximumf>, %13, %cst_15 [3] : vector<1x4x4x4xf32> to vector<1x4x4xf32>
    %15 = vector.shape_cast %14 : vector<1x4x4xf32> to vector<1x4x4x1xf32>
    %16 = vector.extract_strided_slice %12 {offsets = [0, 0, 0, 4], sizes = [1, 4, 4, 4], strides = [1, 1, 1, 1]} : vector<1x4x4x16xf32> to vector<1x4x4x4xf32>
    %cst_16 = arith.constant dense<0xFF800000> : vector<1x4x4xf32>
    %17 = vector.multi_reduction <maximumf>, %16, %cst_16 [3] : vector<1x4x4x4xf32> to vector<1x4x4xf32>
    %18 = vector.shape_cast %17 : vector<1x4x4xf32> to vector<1x4x4x1xf32>
    %19 = vector.extract_strided_slice %12 {offsets = [0, 0, 0, 8], sizes = [1, 4, 4, 4], strides = [1, 1, 1, 1]} : vector<1x4x4x16xf32> to vector<1x4x4x4xf32>
    %cst_17 = arith.constant dense<0xFF800000> : vector<1x4x4xf32>
    %20 = vector.multi_reduction <maximumf>, %19, %cst_17 [3] : vector<1x4x4x4xf32> to vector<1x4x4xf32>
    %21 = vector.shape_cast %20 : vector<1x4x4xf32> to vector<1x4x4x1xf32>
    %22 = vector.extract_strided_slice %12 {offsets = [0, 0, 0, 12], sizes = [1, 4, 4, 4], strides = [1, 1, 1, 1]} : vector<1x4x4x16xf32> to vector<1x4x4x4xf32>
    %cst_18 = arith.constant dense<0xFF800000> : vector<1x4x4xf32>
    %23 = vector.multi_reduction <maximumf>, %22, %cst_18 [3] : vector<1x4x4x4xf32> to vector<1x4x4xf32>
    %24 = vector.shape_cast %23 : vector<1x4x4xf32> to vector<1x4x4x1xf32>
    %25 = tpu.concatenate %15, %18, %21, %24 in 3 : vector<1x4x4x1xf32>, vector<1x4x4x1xf32>, vector<1x4x4x1xf32>, vector<1x4x4x1xf32> -> vector<1x4x4x4xf32>
    %26 = vector.extract_strided_slice %25 {offsets = [0, 0, 0, 0], sizes = [1, 4, 2, 4], strides = [1, 1, 1, 1]} : vector<1x4x4x4xf32> to vector<1x4x2x4xf32>
    %cst_19 = arith.constant dense<0xFF800000> : vector<1x4x4xf32>
    %27 = vector.multi_reduction <maximumf>, %26, %cst_19 [2] : vector<1x4x2x4xf32> to vector<1x4x4xf32>
    %28 = vector.shape_cast %27 : vector<1x4x4xf32> to vector<1x4x1x4xf32>
    %29 = vector.extract_strided_slice %25 {offsets = [0, 0, 2, 0], sizes = [1, 4, 2, 4], strides = [1, 1, 1, 1]} : vector<1x4x4x4xf32> to vector<1x4x2x4xf32>
    %cst_20 = arith.constant dense<0xFF800000> : vector<1x4x4xf32>
    %30 = vector.multi_reduction <maximumf>, %29, %cst_20 [2] : vector<1x4x2x4xf32> to vector<1x4x4xf32>
    %31 = vector.shape_cast %30 : vector<1x4x4xf32> to vector<1x4x1x4xf32>
    %32 = tpu.concatenate %28, %31 in 2 : vector<1x4x1x4xf32>, vector<1x4x1x4xf32> -> vector<1x4x2x4xf32>
    %33 = vector.extract_strided_slice %32 {offsets = [0, 0, 0, 0], sizes = [1, 4, 2, 2], strides = [1, 1, 1, 1]} : vector<1x4x2x4xf32> to vector<1x4x2x2xf32>
    %cst_21 = arith.constant dense<0xFF800000> : vector<1x4x2xf32>
    %34 = vector.multi_reduction <maximumf>, %33, %cst_21 [3] : vector<1x4x2x2xf32> to vector<1x4x2xf32>
    %35 = vector.shape_cast %34 : vector<1x4x2xf32> to vector<1x4x2x1xf32>
    %36 = vector.extract_strided_slice %32 {offsets = [0, 0, 0, 2], sizes = [1, 4, 2, 2], strides = [1, 1, 1, 1]} : vector<1x4x2x4xf32> to vector<1x4x2x2xf32>
    %cst_22 = arith.constant dense<0xFF800000> : vector<1x4x2xf32>
    %37 = vector.multi_reduction <maximumf>, %36, %cst_22 [3] : vector<1x4x2x2xf32> to vector<1x4x2xf32>
    %38 = vector.shape_cast %37 : vector<1x4x2xf32> to vector<1x4x2x1xf32>
    %39 = tpu.concatenate %35, %38 in 3 : vector<1x4x2x1xf32>, vector<1x4x2x1xf32> -> vector<1x4x2x2xf32>
    %cst_23 = arith.constant dense<0xFF800000> : vector<1x4x2xf32>
    %40 = vector.multi_reduction <maximumf>, %39, %cst_23 [2] : vector<1x4x2x2xf32> to vector<1x4x2xf32>
    %41 = vector.shape_cast %40 : vector<1x4x2xf32> to vector<1x4x1x2xf32>
    %cst_24 = arith.constant dense<0xFF800000> : vector<1x4x1xf32>
    %42 = vector.multi_reduction <maximumf>, %41, %cst_24 [3] : vector<1x4x1x2xf32> to vector<1x4x1xf32>
    %43 = vector.shape_cast %42 : vector<1x4x1xf32> to vector<1x4x1x1xf32>
    %c0_25 = arith.constant 0 : index
    %c0_26 = arith.constant 0 : index
    %c0_27 = arith.constant 0 : index
    %c0_28 = arith.constant 0 : index
    %44 = vector.load %arg3[%c0_25, %c0_26, %c0_27, %c0_28] : memref<1x4x1x1xf32, #tpu.memory_space<vmem>>, vector<1x4x1x1xf32>
    tpu.vector_store %arg3[%c0_25, %c0_26, %c0_27, %c0_28], %43 {strides = array<i32>} : memref<1x4x1x1xf32, #tpu.memory_space<vmem>>, vector<1x4x1x1xf32>,
    %c0_29 = arith.constant 0 : index
    %c0_30 = arith.constant 0 : index
    %c0_31 = arith.constant 0 : index
    %c0_32 = arith.constant 0 : index
    %45 = vector.load %arg4[%c0_29, %c0_30, %c0_31, %c0_32] : memref<1x4x2x2xf32, #tpu.memory_space<vmem>>, vector<1x4x2x2xf32>
    tpu.vector_store %arg4[%c0_29, %c0_30, %c0_31, %c0_32], %39 {strides = array<i32>} : memref<1x4x2x2xf32, #tpu.memory_space<vmem>>, vector<1x4x2x2xf32>,
    %c0_33 = arith.constant 0 : index
    %c0_34 = arith.constant 0 : index
    %c0_35 = arith.constant 0 : index
    %c0_36 = arith.constant 0 : index
    %46 = vector.load %arg5[%c0_33, %c0_34, %c0_35, %c0_36] : memref<1x4x4x4xf32, #tpu.memory_space<vmem>>, vector<1x4x4x4xf32>
    tpu.vector_store %arg5[%c0_33, %c0_34, %c0_35, %c0_36], %25 {strides = array<i32>} : memref<1x4x4x4xf32, #tpu.memory_space<vmem>>, vector<1x4x4x4xf32>,
    return
  }
  func.func @transform_0(%arg0: i32, %arg1: i32) -> (i32, i32, i32, i32) {
    %c0_i32 = arith.constant 0 : i32
    %c0_i32_0 = arith.constant 0 : i32
    %c0_i32_1 = arith.constant 0 : i32
    return %arg0, %arg1, %c0_i32, %c0_i32_0 : i32, i32, i32, i32
  }
  func.func @transform_1(%arg0: i32, %arg1: i32) -> (i32, i32, i32, i32) {
    %c0_i32 = arith.constant 0 : i32
    %c0_i32_0 = arith.constant 0 : i32
    %c0_i32_1 = arith.constant 0 : i32
    return %arg0, %arg1, %c0_i32, %c0_i32_0 : i32, i32, i32, i32
  }
  func.func @transform_2(%arg0: i32, %arg1: i32) -> (i32, i32, i32, i32) {
    %c0_i32 = arith.constant 0 : i32
    %c0_i32_0 = arith.constant 0 : i32
    %c0_i32_1 = arith.constant 0 : i32
    return %arg0, %arg1, %c0_i32, %c0_i32_0 : i32, i32, i32, i32
  }
  func.func @transform_3(%arg0: i32, %arg1: i32) -> (i32, i32, i32, i32) {
    %c0_i32 = arith.constant 0 : i32
    %c0_i32_0 = arith.constant 0 : i32
    %c0_i32_1 = arith.constant 0 : i32
    return %arg0, %arg1, %c0_i32, %c0_i32_0 : i32, i32, i32, i32
  }
}

</mosaic_0001>

<bundles_post_ra>
// kernel: tpu_custom_call.1
= control target key start
LH: loop header
LB: loop body
LE: loop exit
PB: predicated region body
PF: predicated region fallthrough
CT: control target
= control target key end

     0   :  { %9 = vsyncpa [#allocation3], 0  ;;  %s1340_s0 = inlined_call_operand.hbm [shape: f32[2,4,16,16], index: 0, kind: input, shape index: {}]   ;;  %s1341_s1 = inlined_call_operand.vmem [shape: f32[2,4,1,1], index: 1, kind: output, shape index: {0}]   ;;  %s1342_s2 = inlined_call_operand.vmem [shape: f32[2,4,2,2], index: 2, kind: output, shape index: {1}]   ;;  %s1343_s3 = inlined_call_operand.hbm [shape: f32[2,4,4,4], index: 3, kind: output, shape index: {2}]  }
   0x1   :  { %11 = vsyncpa [#allocation3 + $0x1], 0 }
   0x2   :  { %12 = vsyncpa [#allocation4], 0 }
   0x3   :  { %14 = vsyncpa [#allocation4 + $0x1], 0  ;;  %s1035_s12 = smov 0   ;;  %s1037_s13 = smov 0  }
   0x4   :  { %s1039_s14 = smov 0   ;;  %s1041_s15 = smov 0  }
   0x5   :  { %s1043_s16 = smov 0   ;;  %s1045_s17 = smov 0  }
   0x6 LB: > { %s808_s18 = sadd.s32 4294967295, %s1007_s17   ;;  %s809_s19 = sadd.s32 4294967294, %s1007_s17   ;;  %s1007_s17 = sphi %s1045_s17, %s20_s17   ;;  %s1003_s16 = sphi %s1043_s16, %s1358_s16   ;;  %s999_s15 = sphi %s1041_s15, %s1357_s15   ;;  %s995_s14 = sphi %s1039_s14, %s1356_s14   ;;  %s991_s13 = sphi %s1037_s13, %s1355_s13   ;;  %s987_s12 = sphi %s1035_s12, %s1354_s12  }
   0x7   : > { %s32_s20 = sadd.s32 1, %s1003_s16  ;;  %s41_s21 = sadd.s32 1, %s995_s14 }
   0x8   : > { %p34_p0 = scmp.ge.s32.totalorder %s32_s20, 2  ;;  %p48_p1 = scmp.ne.s32.totalorder %s995_s14, %s991_s13 }
   0x9   : > { %p49_p2 = scmp.eq.s32.totalorder %s1007_s17, 0  ;;  %p54_p3 = scmp.ne.s32.totalorder %s991_s13, %s987_s12 }
   0xa   : > { %s1360_s20 = smov (%p34_p0, %s32_s20), 0  ;;  %p55_p5 = scmp.eq.s32.totalorder %s808_s18, 0 }
   0xb   : > { %p1076_p4 = por %p49_p2, %p48_p1  ;;  %s36_s23 = ssub.s32 %s1003_s16, %s1360_s20 }
   0xc   : > { %p136_p6 = scmp.eq.s32.totalorder %s808_s18, 1  ;;  %p39_p7 = scmp.eq.s32.totalorder %s36_s23, 0 }
   0xd   : > { %p1082_p8 = por %p55_p5, %p54_p3  ;;  %p142_p10 = scmp.eq.s32.totalorder %s809_s19, 1 }
   0xe   : > { %p1086_p9 = por %p136_p6, %p48_p1  ;;  %p841_p13 = scmp.lt.s32.totalorder %s1007_s17, 2 }
   0xf   : > { %s1091_s26 = scalar_select %p39_p7, %s995_s14, %s41_s21  }
  0x10   : > { %s1347_s25 = scalar_select %p1086_p9, 1, 0 }
  0x11   : > { %p1093_p11 = por %p142_p10, %p54_p3  ;;  %s162_s28 = sand.u32 1, %s995_s14  }
  0x12   : > { %s812_s29 = sshll.u32 %s162_s28, 6  ;;  %s826_s30 = sshll.u32 %s1003_s16, 10 }
  0x13   : > { %s1348_s27 = scalar_select %p1093_p11, 1, 0 }
  0x14   : > { %s1104_s6 = scalar_lea.hbm %s1340_s0, %s826_s30  ;;  %s166_s7 = scalar_lea.vmem [#allocation2], %s812_s29 }
  0x15   : > { %s176_s8 = sshll.u32 %s166_s7, 4  ;;  %p1110_p0 = pnand %p841_p13, %p1076_p4  ;;  %s1106_s8 = int_to_ptr.vmem [resolvable:$true] %s176_s8 }
  0x16   : > { %s1115_s10 = scalar_lea.sflag [#allocation3], %s162_s28  ;;  %s895_s11 = scalar_lea.hbm %s1104_s6, 1024 }
  0x17   : > { %p896_p2 = scmp.ne.s32.totalorder %s1104_s6, %s895_s11  ;;  %p897_p3 = pneg %p1110_p0 }
  0x18   : > { %s900_s21 = scalar_lea.hbm %s1340_s0, 2048  ;;  %p901_p4 = scmp.lt.u32.totalorder %s1104_s6, %s1340_s0 }
  0x19   : > { %p898_p5 = pnand %p897_p3, %p896_p2  ;;  %p902_p7 = scmp.lt.u32.totalorder %s900_s21, %s895_s11 }
  0x1a   : > { %p904_p13 = scmp.lt.u32.totalorder %s895_s11, %s1104_s6 }
  0x1b   : > { %p899_p6 = pneg %p898_p5  ;;  %p903_p10 = por %p902_p7, %p901_p4 }
  0x1d   : > { %p905_p12 = por %p904_p13, %p903_p10 }
  0x1f   : > { %p906_p1 = pnand %p905_p12, %p899_p6 }
  0x21   : > { %909 = shalt.err (!%p906_p1)
}
  0x22   : > { %s910_s28 = scalar_lea.vmem %s1106_s8, 1024  ;;  %s1009_s29 = smov [#allocation2]  }
  0x23   : > { %p911_p2 = scmp.ne.s32.totalorder %s1106_s8, %s910_s28  ;;  %s915_s30 = sshll.u32 %s1009_s29, 4  ;;  %s916_s30 = int_to_ptr.vmem [resolvable:$false] %s915_s30 }
  0x24   : > { %s917_s4 = scalar_lea.vmem %s916_s30, 2048  ;;  %p918_p9 = scmp.lt.s32.totalorder %s1106_s8, %s916_s30 }
  0x25   : > { %p913_p5 = pnand %p911_p2, %p897_p3  ;;  %p919_p4 = scmp.lt.s32.totalorder %s917_s4, %s910_s28 }
  0x27   : > { %p914_p11 = pneg %p913_p5  ;;  %p920_p7 = por %p919_p4, %p918_p9 }
  0x29   : > { %p921_p10 = pnand %p920_p7, %p914_p11 }
  0x2b   : > { %924 = shalt.err (!%p921_p10)
}
  0x2c   : > { %s1010_s5 = smov 128   ;;  %s1011_s7 = smov 8  }
  0x2d   : > { %836 = dma.hbm_to_vmem [thread:$0]  (!%p1110_p0), %s1104_s6, 1024, %s1106_s8, %s1115_s10, %s1010_s5, %s1010_s5, %s1011_s7  }
  0x2e   : > { %p184_p12 = scmp.lt.s32.totalorder %s1007_s17, 3  ;;  %p1350_p1 = scmp.ge.s32.totalorder %s1007_s17, 1 }
  0x30   : > { %p185_p3 = pnand %p1350_p1, %p184_p12 }
  0x31   : > { %s1147_s11 = sand.u32 (!%p185_p3), 1, %s991_s13  }
  0x32   : > { %188 = sbr.rel (%p185_p3) target bundleno = 591 (0x24f), region = 24  ;;  %s816_s18 = sshll.u32 (!%p185_p3), %s1147_s11, 6 }
  0x33   : > { %s191_s19 = scalar_lea.sflag (!%p185_p3), [#allocation3], %s1147_s11  ;;  %s1151_s21 = scalar_lea.vmem (!%p185_p3), [#allocation2], %s816_s18 }
  0x39   : > { %978 = dma.done.wait (%p1082_p8), %s191_s19, 1024  }
  0x3a   : > { %980 = vsyncadd (%p1082_p8), %s191_s19, 4294966272  ;;  %vm259_vm0 = vcmask 125952   ;;  %v257_v0 = vld [vmem:[%s1151_s21 + $0x20] sm:$0xf]  ;;  %v290_v1 = vld [vmem:[%s1151_s21 + $0x24] sm:$0xf] }
  0x3b   : > { %v322_v2 = vld [vmem:[%s1151_s21 + $0x28] sm:$0xf]  ;;  %v274_v3 = vsel %vm259_vm0, %v257_v0, -inf  ;;  %v306_v4 = vsel %vm259_vm0, %v290_v1, -inf  ;;  %v354_v6 = vld [vmem:[%s1151_s21 + $0x2c] sm:$0xf] }
  0x3c   : > { %v338_v5 = vsel %vm259_vm0, %v322_v2, -inf  ;;  %v275_v7 = vrot.slane %v274_v3, 4  ;;  %v307_v8 = vrot.slane %v306_v4, 4  ;;  %v370_v10 = vsel %vm259_vm0, %v354_v6, -inf  ;;  %v255_v11 = vld [vmem:[%s1151_s21] sm:$0xf] }
  0x3d   : > { %v339_v9 = vrot.slane %v338_v5, 4  ;;  %v371_v12 = vrot.slane %v370_v10, 4  ;;  %vm384_vm1 = vcmask 1040384   ;;  %v260_v13 = vsel %vm259_vm0, %v255_v11, -inf  ;;  %v288_v14 = vld [vmem:[%s1151_s21 + $0x4] sm:$0xf] }
  0x3e   : > { %v320_v15 = vld [vmem:[%s1151_s21 + $0x8] sm:$0xf]  ;;  %v276_v16 = vmax.f32 %v274_v3, %v275_v7  ;;  %v308_v17 = vmax.f32 %v306_v4, %v307_v8  ;;  %vm389_vm2 = vcmask 1041408   ;;  %v261_v19 = vrot.slane %v260_v13, 4  ;;  %v352_v20 = vld [vmem:[%s1151_s21 + $0xc] sm:$0xf] }
  0x3f   : > { %v340_v18 = vmax.f32 %v338_v5, %v339_v9  ;;  %v372_v21 = vmax.f32 %v370_v10, %v371_v12  ;;  %vm394_vm3 = vcmask 1042432   ;;  %v292_v22 = vsel %vm259_vm0, %v288_v14, -inf  ;;  %v258_v45 = vld [vmem:[%s1151_s21 + $0x30] sm:$0xf]  ;;  %v291_v50 = vld [vmem:[%s1151_s21 + $0x34] sm:$0xf] }
  0x40   : > { %v324_v23 = vsel %vm259_vm0, %v320_v15, -inf  ;;  %v356_v24 = vsel %vm259_vm0, %v352_v20, -inf  ;;  %v277_v25 = vrot.slane %v276_v16, 2  ;;  %v309_v26 = vrot.slane %v308_v17, 2  ;;  %v323_v59 = vld [vmem:[%s1151_s21 + $0x38] sm:$0xf] }
  0x41   : > { %v341_v27 = vrot.slane %v340_v18, 2  ;;  %vm399_vm4 = vcmask 27648   ;;  %v262_v28 = vmax.f32 %v260_v13, %v261_v19  ;;  %v373_v29 = vrot.slane %v372_v21, 2  ;;  %v355_v0 = vld [vmem:[%s1151_s21 + $0x3c] sm:$0xf]  ;;  %s817_s24 = sshll.u32 %s1147_s11, 4 }
  0x42   : > { %v293_v30 = vrot.slane %v292_v22, 4  ;;  %v325_v31 = vrot.slane %v324_v23, 4  ;;  %v357_v32 = vrot.slane %v356_v24, 4  ;;  %v278_v33 = vmax.f32 %v276_v16, %v277_v25  ;;  %v256_v5 = vld [vmem:[%s1151_s21 + $0x10] sm:$0xf]  ;;  %s1223_s6 = scalar_lea.vmem [#allocation5], %s817_s24 }
  0x43   : > { %v310_v34 = vmax.f32 %v308_v17, %v309_v26  ;;  %v342_v35 = vmax.f32 %v340_v18, %v341_v27  ;;  %v263_v36 = vrot.slane %v262_v28, 2  ;;  %v374_v37 = vmax.f32 %v372_v21, %v373_v29  ;;  %v289_v10 = vld [vmem:[%s1151_s21 + $0x14] sm:$0xf]  ;;  %v321_v27 = vld [vmem:[%s1151_s21 + $0x18] sm:$0xf]  ;;  %p236_p8 = scmp.lt.s32.totalorder %s999_s15, 1 }
  0x44   : > { %v294_v38 = vmax.f32 %v292_v22, %v293_v30  ;;  %v326_v39 = vmax.f32 %v324_v23, %v325_v31  ;;  %v358_v40 = vmax.f32 %v356_v24, %v357_v32  ;;  %v279_v41 = vrot.slane %v278_v33, 1  ;;  %s652_s28 = sshll.u32 %s1223_s6, 4  ;;  %s828_s29 = sshll.u32 %s999_s15, 8  ;;  %s1281_s28 = int_to_ptr.vmem [resolvable:$true] %s652_s28 }
  0x45   : > { %v311_v42 = vrot.slane %v310_v34, 1  ;;  %v343_v43 = vrot.slane %v342_v35, 1  ;;  %v264_v44 = vmax.f32 %v262_v28, %v263_v36  ;;  %v375_v46 = vrot.slane %v374_v37, 1  ;;  %v353_v36 = vld [vmem:[%s1151_s21 + $0x1c] sm:$0xf]  ;;  %s1258_s8 = scalar_select %p236_p8, %s999_s15, 1 }
  0x46   : > { %v295_v47 = vrot.slane %v294_v38, 2  ;;  %v327_v48 = vrot.slane %v326_v39, 2  ;;  %v359_v49 = vrot.slane %v358_v40, 2  ;;  %v280_v51 = vmax.f32 %v278_v33, %v279_v41  ;;  %s1287_s5 = scalar_lea.hbm %s1343_s3, %s828_s29  ;;  %s629_s7 = scalar_lea.sflag [#allocation4], %s1147_s11 }
  0x47   : > { %v312_v52 = vmax.f32 %v310_v34, %v311_v42  ;;  %v344_v53 = vmax.f32 %v342_v35, %v343_v43  ;;  %v265_v54 = vrot.slane %v264_v44, 1  ;;  %v376_v55 = vmax.f32 %v374_v37, %v375_v46  ;;  %s827_s9 = sshll.u32 %s1258_s8, 3  ;;  %s925_s18 = scalar_lea.vmem %s1281_s28, 256 }
  0x48   : > { %v296_v56 = vmax.f32 %v294_v38, %v295_v47  ;;  %v328_v57 = vmax.f32 %v326_v39, %v327_v48  ;;  %v360_v58 = vmax.f32 %v358_v40, %v359_v49  ;;  %v281_v62 = vsel %vm259_vm0, %v258_v45, -inf  ;;  %s252_s23 = scalar_lea.vmem %s1342_s2, %s827_s9  ;;  %p926_p9 = scmp.ne.s32.totalorder %s1281_s28, %s925_s18 }
  0x49   : > { %v387_v60 = vsel %vm384_vm1, %v280_v51, %v312_v52  ;;  %v266_v61 = vmax.f32 %v264_v44, %v265_v54  ;;  %v313_v63 = vsel %vm259_vm0, %v291_v50, -inf  ;;  %v282_v7 = vrot.slane %v281_v62, 4  ;;  %p1351_p11 = scmp.ne.s32.totalorder %s1347_s25, 0  ;;  %s1012_s19 = smov [#allocation5]  }
  0x4a   : > { %v392_v1 = vsel %vm389_vm2, %v387_v60, %v344_v53  ;;  %v297_v2 = vrot.slane %v296_v56, 1  ;;  %v329_v3 = vrot.slane %v328_v57, 1  ;;  %v361_v4 = vrot.slane %v360_v58, 1  ;;  %s929_s21 = sshll.u32 %s1012_s19, 4  ;;  %s930_s21 = int_to_ptr.vmem [resolvable:$false] %s929_s21 }
  0x4b   : > { %v1183_v6 = vsel %vm394_vm3, %v392_v1, %v376_v55  ;;  %v314_v8 = vrot.slane %v313_v63, 4  ;;  %v345_v9 = vsel %vm259_vm0, %v323_v59, -inf  ;;  %v283_v15 = vmax.f32 %v281_v62, %v282_v7  ;;  %p927_p0 = pnand %p926_p9, %p1351_p11  ;;  %s931_s24 = scalar_lea.vmem %s930_s21, 512 }
  0x4c   : > { %v406_v11 = vsel %vm399_vm4, %v1183_v6, -inf  ;;  %v298_v12 = vmax.f32 %v296_v56, %v297_v2  ;;  %v330_v13 = vmax.f32 %v328_v57, %v329_v3  ;;  %v362_v14 = vmax.f32 %v360_v58, %v361_v4  ;;  %p932_p13 = scmp.lt.s32.totalorder %s1281_s28, %s930_s21  ;;  %p933_p2 = scmp.lt.s32.totalorder %s931_s24, %s925_s18 }
  0x4d   : > { %407 = vmax.xlane.f32.xlu1 %v406_v11  ;;  %v315_v16 = vmax.f32 %v313_v63, %v314_v8  ;;  %v346_v17 = vrot.slane %v345_v9, 4  ;;  %v377_v18 = vsel %vm259_vm0, %v355_v0, -inf  ;;  %v267_v21 = vsel %vm259_vm0, %v256_v5, -inf  ;;  %p928_p6 = pneg %p927_p0 }
  0x4e   : > { %v385_v19 = vsel %vm384_vm1, %v266_v61, %v298_v12  ;;  %v378_v20 = vrot.slane %v377_v18, 4  ;;  %v299_v22 = vsel %vm259_vm0, %v289_v10, -inf  ;;  %v284_v24 = vrot.slane %v283_v15, 2  ;;  %p934_p5 = por %p933_p2, %p932_p13 }
  0x4f   : > { %v390_v23 = vsel %vm389_vm2, %v385_v19, %v330_v13  ;;  %v316_v25 = vrot.slane %v315_v16, 2  ;;  %v347_v26 = vmax.f32 %v345_v9, %v346_v17  ;;  %v268_v30 = vrot.slane %v267_v21, 4 }
  0x50   : > { %v1196_v28 = vsel %vm394_vm3, %v390_v23, %v362_v14  ;;  %v379_v29 = vmax.f32 %v377_v18, %v378_v20  ;;  %v300_v31 = vrot.slane %v299_v22, 4  ;;  %v285_v33 = vmax.f32 %v283_v15, %v284_v24  ;;  %p935_p4 = pnand %p934_p5, %p928_p6 }
  0x51   : > { %v400_v32 = vsel %vm399_vm4, %v1196_v28, -inf  ;;  %v317_v34 = vmax.f32 %v315_v16, %v316_v25  ;;  %v348_v35 = vrot.slane %v347_v26, 2  ;;  %v269_v38 = vmax.f32 %v267_v21, %v268_v30 }
  0x52   : > { %401 = vmax.xlane.f32.xlu0 %v400_v32  ;;  %v380_v37 = vrot.slane %v379_v29, 2  ;;  %v301_v39 = vmax.f32 %v299_v22, %v300_v31  ;;  %v331_v40 = vsel %vm259_vm0, %v321_v27, -inf  ;;  %v286_v41 = vrot.slane %v285_v33, 1 }
  0x53   : > { %v318_v42 = vrot.slane %v317_v34, 1  ;;  %v349_v43 = vmax.f32 %v347_v26, %v348_v35  ;;  %v332_v44 = vrot.slane %v331_v40, 4  ;;  %v270_v46 = vrot.slane %v269_v38, 2 }
  0x54   : > { %v381_v45 = vmax.f32 %v379_v29, %v380_v37  ;;  %v302_v47 = vrot.slane %v301_v39, 2  ;;  %v363_v48 = vsel %vm259_vm0, %v353_v36, -inf  ;;  %v287_v49 = vmax.f32 %v285_v33, %v286_v41 }
  0x55   : > { %v319_v50 = vmax.f32 %v317_v34, %v318_v42  ;;  %v350_v51 = vrot.slane %v349_v43, 1  ;;  %v333_v52 = vmax.f32 %v331_v40, %v332_v44  ;;  %v271_v54 = vmax.f32 %v269_v38, %v270_v46 }
  0x56   : > { %v382_v53 = vrot.slane %v381_v45, 1  ;;  %v303_v55 = vmax.f32 %v301_v39, %v302_v47  ;;  %v364_v56 = vrot.slane %v363_v48, 4  ;;  %vm412_vm5 = vcmask 60448  }
  0x57   : > { %v351_v57 = vmax.f32 %v349_v43, %v350_v51  ;;  %v388_v58 = vsel %vm384_vm1, %v287_v49, %v319_v50  ;;  %v334_v59 = vrot.slane %v333_v52, 2  ;;  %v272_v61 = vrot.slane %v271_v54, 1 }
  0x58   : > { %v383_v60 = vmax.f32 %v381_v45, %v382_v53  ;;  %v304_v62 = vrot.slane %v303_v55, 1  ;;  %v365_v63 = vmax.f32 %v363_v48, %v364_v56  ;;  %v413_v18 = vsel %vm412_vm5, %v1196_v28, -inf }
  0x59   : > { %v393_v0 = vsel %vm389_vm2, %v388_v58, %v351_v57  ;;  %v335_v1 = vmax.f32 %v333_v52, %v334_v59  ;;  %v273_v3 = vmax.f32 %v271_v54, %v272_v61  ;;  %vm425_vm6 = vcmask 93248  }
  0x5a   : > { %v398_v2 = vsel %vm394_vm3, %v393_v0, %v383_v60  ;;  %v305_v4 = vmax.f32 %v303_v55, %v304_v62  ;;  %v366_v5 = vrot.slane %v365_v63, 2  ;;  %v419_v20 = vsel %vm412_vm5, %v1183_v6, -inf }
  0x5b   : > { %v409_v7 = vsel %vm399_vm4, %v398_v2, -inf  ;;  %v336_v8 = vrot.slane %v335_v1, 1  ;;  %v422_v19 = vsel %vm412_vm5, %v398_v2, -inf  ;;  %v426_v22 = vsel %vm425_vm6, %v1196_v28, -inf }
  0x5c   : > { %410 = vmax.xlane.f32.xlu1 %v409_v7  ;;  %v367_v9 = vmax.f32 %v365_v63, %v366_v5  ;;  %v386_v10 = vsel %vm384_vm1, %v273_v3, %v305_v4  ;;  %v435_v23 = vsel %vm425_vm6, %v398_v2, -inf  ;;  %vm438_vm7 = vcmask 126048  }
  0x5d   : > { %v337_v11 = vmax.f32 %v335_v1, %v336_v8  ;;  %v432_v24 = vsel %vm425_vm6, %v1183_v6, -inf  ;;  %v439_v26 = vsel %vm438_vm7, %v1196_v28, -inf  ;;  %v448_v27 = vsel %vm438_vm7, %v398_v2, -inf }
  0x5e   : > { %v368_v12 = vrot.slane %v367_v9, 1  ;;  %v445_v29 = vsel %vm438_vm7, %v1183_v6, -inf  ;;  %vm451_vm8 = vcmask 7168   ;;  %vm456_vm9 = vcmask 15360  }
  0x5f   : > { %v391_v13 = vsel %vm389_vm2, %v386_v10, %v337_v11  ;;  %vm461_vm10 = vcmask 23552   ;;  %vm466_vm11 = vcmask 25600   ;;  %vm495_vm12 = vcmask 27650  }
  0x60   : > { %v369_v14 = vmax.f32 %v367_v9, %v368_v12  ;;  %vm528_vm13 = vcmask 9216   ;;  %vm541_vm14 = vcmask 25616  }
  0x62   : > { %v396_v15 = vsel %vm394_vm3, %v391_v13, %v369_v14 }
  0x63   : > { %v403_v16 = vsel %vm399_vm4, %v396_v15, -inf  ;;  %v416_v17 = vsel %vm412_vm5, %v396_v15, -inf  ;;  %v429_v21 = vsel %vm425_vm6, %v396_v15, -inf  ;;  %v442_v25 = vsel %vm438_vm7, %v396_v15, -inf }
  0x64   : > { %404 = vmax.xlane.f32.xlu0 %v403_v16  ;;  %417 = vmax.xlane.f32.xlu1 %v416_v17 }
  0x68   : > { %414 = vmax.xlane.f32.xlu0 %v413_v18  ;;  %423 = vmax.xlane.f32.xlu1 %v422_v19 }
  0x6c   : > { %420 = vmax.xlane.f32.xlu0 %v419_v20  ;;  %430 = vmax.xlane.f32.xlu1 %v429_v21 }
  0x70   : > { %427 = vmax.xlane.f32.xlu0 %v426_v22  ;;  %436 = vmax.xlane.f32.xlu1 %v435_v23 }
  0x74   : > { %433 = vmax.xlane.f32.xlu0 %v432_v24  ;;  %443 = vmax.xlane.f32.xlu1 %v442_v25 }
  0x78   : > { %440 = vmax.xlane.f32.xlu0 %v439_v26  ;;  %449 = vmax.xlane.f32.xlu1 %v448_v27 }
  0x7c   : > { %446 = vmax.xlane.f32.xlu0 %v445_v29 }
  0xda   : > { %v408_v30 = vpop.xlane.xlu1 %407 }
  0xdf   : > { %v402_v31 = vpop.xlane.xlu0 %401 }
  0xe9   : > { %v411_v32 = vpop.xlane.xlu1 %410 }
  0xf1   : > { %v405_v33 = vpop.xlane.xlu0 %404  ;;  %v418_v34 = vpop.xlane.xlu1 %417 }
  0xf2   : > { %v453_v28 = vsel %vm451_vm8, %v405_v33, %v418_v34 }
  0xf5   : > { %v415_v35 = vpop.xlane.xlu0 %414  ;;  %v424_v36 = vpop.xlane.xlu1 %423 }
  0xf6   : > { %v452_v46 = vsel %vm451_vm8, %v402_v31, %v415_v35  ;;  %v455_v47 = vsel %vm451_vm8, %v411_v32, %v424_v36 }
  0xf9   : > { %v421_v37 = vpop.xlane.xlu0 %420  ;;  %v431_v38 = vpop.xlane.xlu1 %430 }
  0xfa   : > { %v458_v6 = vsel %vm456_vm9, %v453_v28, %v431_v38  ;;  %v454_v50 = vsel %vm451_vm8, %v408_v30, %v421_v37 }
  0xfd   : > { %v428_v39 = vpop.xlane.xlu0 %427  ;;  %v437_v40 = vpop.xlane.xlu1 %436 }
  0xfe   : > { %v457_v51 = vsel %vm456_vm9, %v452_v46, %v428_v39  ;;  %v460_v52 = vsel %vm456_vm9, %v455_v47, %v437_v40 }
 0x101   : > { %v434_v41 = vpop.xlane.xlu0 %433  ;;  %v444_v42 = vpop.xlane.xlu1 %443 }
 0x102   : > { %v463_v43 = vsel %vm461_vm10, %v458_v6, %v444_v42  ;;  %v459_v3 = vsel %vm456_vm9, %v454_v50, %v434_v41 }
 0x103   : > { %v474_v44 = vsel %vm466_vm11, %v463_v43, -inf  ;;  %v503_v45 = vsel %vm495_vm12, %v463_v43, -inf  ;;  %608 = vst.msk [vmem:[%s1223_s6 + $0x4] sm:$0xf] %vm399_vm4, %v463_v43 }
 0x104   : > { %v475_v48 = vrot.slane %v474_v44, 4  ;;  %v504_v49 = vrot.slane %v503_v45, 4 }
 0x105   : > { %v441_v53 = vpop.xlane.xlu0 %440  ;;  %v450_v54 = vpop.xlane.xlu1 %449 }
 0x106   : > { %v476_v55 = vmax.f32 %v474_v44, %v475_v48  ;;  %v505_v56 = vmax.f32 %v503_v45, %v504_v49  ;;  %v462_v57 = vsel %vm461_vm10, %v457_v51, %v441_v53  ;;  %v465_v58 = vsel %vm461_vm10, %v460_v52, %v450_v54 }
 0x107   : > { %v467_v59 = vsel %vm466_vm11, %v462_v57, -inf  ;;  %v496_v60 = vsel %vm495_vm12, %v462_v57, -inf  ;;  %607 = vst.msk [vmem:[%s1223_s6] sm:$0xf] %vm399_vm4, %v462_v57  ;;  %v488_v61 = vsel %vm466_vm11, %v465_v58, -inf  ;;  %v517_v62 = vsel %vm495_vm12, %v465_v58, -inf }
 0x108   : > { %610 = vst.msk [vmem:[%s1223_s6 + $0xc] sm:$0xf] %vm399_vm4, %v465_v58  ;;  %v477_v63 = vrot.slane %v476_v55, 2  ;;  %v506_v0 = vrot.slane %v505_v56, 2  ;;  %v468_v1 = vrot.slane %v467_v59, 4  ;;  %v497_v2 = vrot.slane %v496_v60, 4 }
 0x109   : > { %v489_v4 = vrot.slane %v488_v61, 4  ;;  %v518_v5 = vrot.slane %v517_v62, 4  ;;  %v447_v7 = vpop.xlane.xlu0 %446 }
 0x10a   : > { %v478_v8 = vmax.f32 %v476_v55, %v477_v63  ;;  %v507_v9 = vmax.f32 %v505_v56, %v506_v0  ;;  %v469_v10 = vmax.f32 %v467_v59, %v468_v1  ;;  %v498_v11 = vmax.f32 %v496_v60, %v497_v2 }
 0x10b   : > { %v490_v12 = vmax.f32 %v488_v61, %v489_v4  ;;  %v519_v13 = vmax.f32 %v517_v62, %v518_v5  ;;  %v464_v14 = vsel %vm461_vm10, %v459_v3, %v447_v7 }
 0x10c   : > { %v470_v15 = vrot.slane %v469_v10, 2  ;;  %v499_v16 = vrot.slane %v498_v11, 2  ;;  %v481_v17 = vsel %vm466_vm11, %v464_v14, -inf  ;;  %v510_v18 = vsel %vm495_vm12, %v464_v14, -inf  ;;  %609 = vst.msk [vmem:[%s1223_s6 + $0x8] sm:$0xf] %vm399_vm4, %v464_v14 }
 0x10d   : > { %v491_v19 = vrot.slane %v490_v12, 2  ;;  %v520_v20 = vrot.slane %v519_v13, 2  ;;  %v482_v21 = vrot.slane %v481_v17, 4  ;;  %v511_v22 = vrot.slane %v510_v18, 4 }
 0x10e   : > { %v471_v23 = vmax.f32 %v469_v10, %v470_v15  ;;  %v500_v24 = vmax.f32 %v498_v11, %v499_v16  ;;  %v479_v25 = vrot.slane %v478_v8, 1  ;;  %v508_v26 = vrot.slane %v507_v9, 1 }
 0x10f   : > { %v492_v27 = vmax.f32 %v490_v12, %v491_v19  ;;  %v521_v29 = vmax.f32 %v519_v13, %v520_v20  ;;  %v483_v30 = vmax.f32 %v481_v17, %v482_v21  ;;  %v512_v31 = vmax.f32 %v510_v18, %v511_v22 }
 0x110   : > { %v480_v32 = vmax.f32 %v478_v8, %v479_v25  ;;  %v509_v33 = vmax.f32 %v507_v9, %v508_v26  ;;  %v472_v34 = vrot.slane %v471_v23, 1  ;;  %v501_v35 = vrot.slane %v500_v24, 1 }
 0x111   : > { %v484_v36 = vrot.slane %v483_v30, 2  ;;  %v513_v37 = vrot.slane %v512_v31, 2  ;;  %v493_v38 = vrot.slane %v492_v27, 1  ;;  %v522_v39 = vrot.slane %v521_v29, 1 }
 0x112   : > { %v525_v40 = vsel %vm384_vm1, %v480_v32, %v509_v33  ;;  %v473_v28 = vmax.f32 %v471_v23, %v472_v34  ;;  %v502_v6 = vmax.f32 %v500_v24, %v501_v35 }
 0x113   : > { %v485_v41 = vmax.f32 %v483_v30, %v484_v36  ;;  %v514_v42 = vmax.f32 %v512_v31, %v513_v37  ;;  %v532_v43 = vsel %vm528_vm13, %v525_v40, -inf  ;;  %v494_v44 = vmax.f32 %v492_v27, %v493_v38 }
 0x114   : > { %533 = vmax.xlane.f32.xlu1 %v532_v43  ;;  %v524_v45 = vsel %vm384_vm1, %v473_v28, %v502_v6  ;;  %v523_v46 = vmax.f32 %v521_v29, %v522_v39  ;;  %v545_v56 = vsel %vm541_vm14, %v525_v40, -inf }
 0x115   : > { %v529_v47 = vsel %vm528_vm13, %v524_v45, -inf  ;;  %v486_v48 = vrot.slane %v485_v41, 1  ;;  %v515_v49 = vrot.slane %v514_v42, 1  ;;  %v542_v57 = vsel %vm541_vm14, %v524_v45, -inf }
 0x116   : > { %530 = vmax.xlane.f32.xlu0 %v529_v47  ;;  %v527_v50 = vsel %vm384_vm1, %v494_v44, %v523_v46 }
 0x117   : > { %v538_v51 = vsel %vm528_vm13, %v527_v50, -inf  ;;  %v487_v52 = vmax.f32 %v485_v41, %v486_v48  ;;  %v516_v53 = vmax.f32 %v514_v42, %v515_v49  ;;  %v551_v58 = vsel %vm541_vm14, %v527_v50, -inf }
 0x118   : > { %539 = vmax.xlane.f32.xlu1 %v538_v51 }
 0x119   : > { %v526_v54 = vsel %vm384_vm1, %v487_v52, %v516_v53 }
 0x11a   : > { %v535_v55 = vsel %vm528_vm13, %v526_v54, -inf  ;;  %v548_v59 = vsel %vm541_vm14, %v526_v54, -inf }
 0x11b   : > { %536 = vmax.xlane.f32.xlu0 %v535_v55 }
 0x11c   : > { %546 = vmax.xlane.f32.xlu1 %v545_v56 }
 0x11f   : > { %543 = vmax.xlane.f32.xlu0 %v542_v57 }
 0x120   : > { %552 = vmax.xlane.f32.xlu1 %v551_v58 }
 0x123   : > { %549 = vmax.xlane.f32.xlu0 %v548_v59 }
 0x1a1   : > { %v534_v60 = vpop.xlane.xlu1 %533 }
 0x1a3   : > { %v531_v61 = vpop.xlane.xlu0 %530 }
 0x1a5   : > { %v540_v62 = vpop.xlane.xlu1 %539 }
 0x1a8   : > { %v537_v63 = vpop.xlane.xlu0 %536 }
 0x1a9   : > { %v547_v0 = vpop.xlane.xlu1 %546 }
 0x1aa   : > { %v555_v1 = vsel %vm451_vm8, %v534_v60, %v547_v0 }
 0x1ab   : > { %v565_v2 = vsel %vm528_vm13, %v555_v1, -inf  ;;  %604 = vst.msk [vmem:[%s252_s23 + $0x2] sm:$0x3] %vm528_vm13, %v555_v1 }
 0x1ac   : > { %v566_v3 = vrot.slane %v565_v2, 4  ;;  %v544_v4 = vpop.xlane.xlu0 %543 }
 0x1ad   : > { %v554_v5 = vsel %vm451_vm8, %v531_v61, %v544_v4  ;;  %v553_v7 = vpop.xlane.xlu1 %552 }
 0x1ae   : > { %v567_v8 = vmax.f32 %v565_v2, %v566_v3  ;;  %v558_v9 = vsel %vm528_vm13, %v554_v5, -inf  ;;  %603 = vst.msk [vmem:[%s252_s23] sm:$0x3] %vm528_vm13, %v554_v5  ;;  %v557_v10 = vsel %vm451_vm8, %v540_v62, %v553_v7 }
 0x1af   : > { %v559_v11 = vrot.slane %v558_v9, 4  ;;  %v579_v12 = vsel %vm528_vm13, %v557_v10, -inf  ;;  %606 = vst.msk [vmem:[%s252_s23 + $0x6] sm:$0x3] %vm528_vm13, %v557_v10 }
 0x1b0   : > { %v568_v13 = vrot.slane %v567_v8, 2  ;;  %v580_v14 = vrot.slane %v579_v12, 4  ;;  %v550_v15 = vpop.xlane.xlu0 %549 }
 0x1b1   : > { %v560_v16 = vmax.f32 %v558_v9, %v559_v11  ;;  %v556_v17 = vsel %vm451_vm8, %v537_v63, %v550_v15 }
 0x1b2   : > { %v581_v18 = vmax.f32 %v579_v12, %v580_v14  ;;  %v572_v19 = vsel %vm528_vm13, %v556_v17, -inf  ;;  %605 = vst.msk [vmem:[%s252_s23 + $0x4] sm:$0x3] %vm528_vm13, %v556_v17  ;;  %v569_v20 = vmax.f32 %v567_v8, %v568_v13 }
 0x1b3   : > { %v561_v21 = vrot.slane %v560_v16, 2  ;;  %v573_v22 = vrot.slane %v572_v19, 4 }
 0x1b4   : > { %v582_v23 = vrot.slane %v581_v18, 2  ;;  %v570_v24 = vrot.slane %v569_v20, 1 }
 0x1b5   : > { %v574_v25 = vmax.f32 %v572_v19, %v573_v22  ;;  %v562_v26 = vmax.f32 %v560_v16, %v561_v21 }
 0x1b6   : > { %v571_v27 = vmax.f32 %v569_v20, %v570_v24  ;;  %v583_v29 = vmax.f32 %v581_v18, %v582_v23 }
 0x1b7   : > { %v575_v30 = vrot.slane %v574_v25, 2  ;;  %v563_v31 = vrot.slane %v562_v26, 1 }
 0x1b8   : > { %v589_v32 = vsel %vm456_vm9, %v571_v27, -inf  ;;  %v584_v33 = vrot.slane %v583_v29, 1 }
 0x1b9   : > { %590 = vmax.xlane.f32.xlu1 %v589_v32  ;;  %v564_v34 = vmax.f32 %v562_v26, %v563_v31  ;;  %v576_v35 = vmax.f32 %v574_v25, %v575_v30 }
 0x1ba   : > { %v585_v36 = vmax.f32 %v583_v29, %v584_v33 }
 0x1bb   : > { %v586_v37 = vsel %vm456_vm9, %v564_v34, -inf  ;;  %v577_v38 = vrot.slane %v576_v35, 1 }
 0x1bc   : > { %587 = vmax.xlane.f32.xlu0 %v586_v37  ;;  %v595_v39 = vsel %vm456_vm9, %v585_v36, -inf }
 0x1bd   : > { %596 = vmax.xlane.f32.xlu1 %v595_v39  ;;  %v578_v40 = vmax.f32 %v576_v35, %v577_v38 }
 0x1bf   : > { %v592_v28 = vsel %vm456_vm9, %v578_v40, -inf }
 0x1c0   : > { %593 = vmax.xlane.f32.xlu0 %v592_v28 }
 0x1c1   : > { %938 = shalt.err (!%p935_p4)
}
 0x1c2   : > { %s939_s15 = scalar_lea.hbm %s1287_s5, 256  ;;  %s943_s10 = scalar_lea.hbm %s1343_s3, 512 }
 0x1c3   : > { %p940_p7 = scmp.ne.s32.totalorder %s1287_s5, %s939_s15  ;;  %p944_p1 = scmp.lt.u32.totalorder %s1287_s5, %s1343_s3 }
 0x1c4   : > { %p945_p3 = scmp.lt.u32.totalorder %s943_s10, %s939_s15  ;;  %p947_p9 = scmp.lt.u32.totalorder %s939_s15, %s1287_s5 }
 0x1c5   : > { %p941_p10 = pnand %p940_p7, %p1351_p11 }
 0x1c6   : > { %p946_p8 = por %p945_p3, %p944_p1 }
 0x1c7   : > { %p942_p12 = pneg %p941_p10 }
 0x1c8   : > { %p948_p0 = por %p947_p9, %p946_p8 }
 0x1ca   : > { %p949_p6 = pnand %p948_p0, %p942_p12 }
 0x1cc   : > { %952 = shalt.err (!%p949_p6)
}
 0x1cd   : > { %s1013_s29 = smov 64   ;;  %s1014_s30 = smov 4   ;;  %vm598_vm15 = vcmask 0  }
 0x1ce   : > { %831 = dma.vmem_to_hbm [thread:$0]  (%p1351_p11), %s1281_s28, 256, %s1287_s5, %s629_s7, %s1013_s29, %s1013_s29, %s1014_s30  }
 0x1cf   : > { %s818_s4 = sshll.u32 %s1258_s8, 2 }
 0x1d0   : > { %s242_s21 = scalar_lea.vmem %s1341_s1, %s818_s4 }
 0x246   : > { %v591_v6 = vpop.xlane.xlu1 %590 }
 0x247   : > { %600 = vst.msk [vmem:[%s242_s21 + $0x1] sm:$0x1] %vm598_vm15, %v591_v6 }
 0x249   : > { %v588_v41 = vpop.xlane.xlu0 %587 }
 0x24a   : > { %599 = vst.msk [vmem:[%s242_s21] sm:$0x1] %vm598_vm15, %v588_v41  ;;  %v597_v42 = vpop.xlane.xlu1 %596 }
 0x24b   : > { %602 = vst.msk [vmem:[%s242_s21 + $0x3] sm:$0x1] %vm598_vm15, %v597_v42 }
 0x24d   : > { %v594_v43 = vpop.xlane.xlu0 %593 }
 0x24e   : > { %601 = vst.msk [vmem:[%s242_s21 + $0x2] sm:$0x1] %vm598_vm15, %v594_v43 }
 0x24f PF: > { %s690_s25 = sand.u32 1, %s987_s12   ;;  %p1352_p11 = scmp.ne.s32.totalorder %s1348_s27, 0 }
 0x250   : > { %p1353_p13 = scmp.ge.s32.totalorder %s1007_s17, 2  ;;  %s691_s11 = scalar_lea.sflag [#allocation4], %s690_s25 }
 0x252   : > { %p838_p2 = pnand %p1353_p13, %p1352_p11 }
 0x254   : > { %982 = dma.done.wait (!%p838_p2), %s691_s11, 256  }
 0x255   : > { %984 = vsyncadd (!%p838_p2), %s691_s11, 4294967040  ;;  %s20_s17 = sadd.s32 1, %s1007_s17   ;;  %s1354_s12 = smov %s991_s13 }
 0x256   : > { %p17_p5 = scmp.ge.s32.totalorder %s20_s17, 4   ;;  %s1355_s13 = smov %s995_s14 }
 0x257   : > { %s1356_s14 = smov %s1091_s26  ;;  %s1357_s15 = smov %s1003_s16 }
 0x258   : > { %s1358_s16 = smov %s1360_s20  ;;  %19 = sbr.rel (!%p17_p5) target bundleno = 6 (0x6), region = 93 }
 0x25f   :  { %696 = vsyncpa [#allocation3], 1 }
 0x260   :  { %698 = vsyncpa [#allocation3 + $0x1], 1 }
 0x261   :  { %699 = vsyncpa [#allocation4], 1 }
 0x262   :  { %701 = vsyncpa [#allocation4 + $0x1], 1 }

</bundles_post_ra>
